<compile_context>
chip_gen: v6e
topology: v6e:2x2x1
jax: 0.10.0
libtpu: 0.0.40
codegen_flags: <defaults>
</compile_context>

<pallas_src>
import functools

import jax
import jax.numpy as jnp
from jax import lax
from jax.experimental import pallas as pl
from jax.experimental.pallas import tpu as pltpu

EPS = 1e-5


def _round_up(x, m):
    return (x + m - 1) // m * m


# --------------------------------------------------------------------------
# Kernel
# --------------------------------------------------------------------------
def _patch_embed_kernel(x_ref, ln1w_ref, cw_ref, fb_ref, ln2w_ref, ln2b_ref,
                        o_ref, *, inv_n1, inv_n2):
    # x_ref:   (Bt, Np_p, Kpad)   f32/bf16  patchified images (pad rows/cols zero)
    # ln1w:    (Np_p, Kpad)       f32       LN1 weight, patchified, zero in pads
    # cw:      (Kpad, Hdpad)      bf16      conv weight as patch->hidden projection
    # fb:      (Np_p, Hdpad)      f32       fused bias = ln1b_patch @ conv_w + conv_b
    # ln2w/b:  (Np_p, Hdpad)      f32       LN2 affine, patchified, zero in pads
    # o_ref:   (Bt, Np_p, Hdpad)  f32/bf16
    x = x_ref[...].astype(jnp.float32)                     # (Bt, Np_p, Kpad)
    bt, np_p, kp = x.shape
    hdp = o_ref.shape[-1]

    # --- LayerNorm over the full (cin, H, W) volume, per batch element.
    # One-pass stats (sum + sumsq).  Padded rows/columns are exactly zero so
    # the sums over the padded tile equal the true sums; divide by the *real*
    # element count via inv_n1 = 1/(Np*K).
    s1 = jnp.sum(x, axis=(1, 2), keepdims=True)            # (Bt,1,1)
    s2 = jnp.sum(x * x, axis=(1, 2), keepdims=True)
    mu1 = s1 * inv_n1
    var1 = jnp.maximum(s2 * inv_n1 - mu1 * mu1, 0.0)
    # Fused normalize+scale chain feeding the bf16 cast (LN1 bias folded into
    # fb).  ln1w is zero in every pad row/col -> xh16 pads are exactly zero.
    xh16 = ((x - mu1) * lax.rsqrt(var1 + EPS)
            * ln1w_ref[...][None]).astype(jnp.bfloat16)    # (Bt, Np_p, Kpad)

    # --- Patch "conv" (kernel_size == stride) as ONE bf16 MXU matmul with the
    # batch tile folded into M.  Np_p % 16 == 0 -> the reshape is a layout
    # no-op for the bf16-packed operand; f32 accumulation.
    y = jnp.dot(xh16.reshape(bt * np_p, kp), cw_ref[...],
                preferred_element_type=jnp.float32)        # (Bt*Np_p, Hdpad)
    y = y.reshape(bt, np_p, hdp) + fb_ref[...][None]       # pad rows/cols stay 0

    # --- LayerNorm over the full (hidden, H/p, W/p) volume, per batch element.
    t1 = jnp.sum(y, axis=(1, 2), keepdims=True)
    t2 = jnp.sum(y * y, axis=(1, 2), keepdims=True)
    mu2 = t1 * inv_n2
    var2 = jnp.maximum(t2 * inv_n2 - mu2 * mu2, 0.0)
    yh = (y - mu2) * lax.rsqrt(var2 + EPS)
    o_ref[...] = (yh * ln2w_ref[...][None]
                  + ln2b_ref[...][None]).astype(o_ref.dtype)


# --------------------------------------------------------------------------
# Wrapper helpers
# --------------------------------------------------------------------------
def _patchify(x, p):
    # (B, C, H, W) -> (B, Np, C*p*p); patch index runs (hp, wp), per-patch
    # flattening order is (c, ph, pw) to match the Conv2d weight layout.
    B, C, H, W = x.shape
    Hp, Wp = H // p, W // p
    x = x.reshape(B, C, Hp, p, Wp, p)
    x = jnp.transpose(x, (0, 2, 4, 1, 3, 5))               # (B, Hp, Wp, C, p, p)
    return x.reshape(B, Hp * Wp, C * p * p)


def _vmem_capacity_bytes():
    # Generation-aware VMEM capacity (128 MiB v5e/v6e, 64 MiB/TC v7x); fall
    # back to the conservative 64 MiB if the query is unavailable.
    try:
        cap = getattr(pltpu.get_tpu_info(), "vmem_capacity_bytes", None)
        if cap:
            return int(cap)
    except Exception:
        pass
    return 64 << 20


def _step_vmem_bytes(bt, np_p, kpad, hdpad, x_bytes, o_bytes):
    # Per-grid-step VMEM footprint, including kernel-internal intermediates.
    x_blk = 2 * bt * np_p * kpad * x_bytes                 # double-buffered input
    o_blk = 2 * bt * np_p * hdpad * o_bytes                # double-buffered output
    # Parameters counted at 2x (conservative: covers the no-Buffered(1) fallback).
    params = 2 * (np_p * kpad * 4 + kpad * hdpad * 2 + 3 * np_p * hdpad * 4)
    # Live intermediates: x(f32) + xh(bf16) + y(f32) + yh(f32).
    interm = bt * np_p * (kpad * (4 + 2) + hdpad * (4 + 4))
    return x_blk + o_blk + params + interm


def _choose_batch_tile(B, step_bytes_fn, vmem_budget, target_steps=8):
    # Largest divisor of B that keeps >= min(target_steps, B) grid steps
    # (per-core work on v7x + pipeline overlap) AND fits the VMEM budget.
    min_steps = min(target_steps, B)
    for bt in range(B, 0, -1):
        if B % bt:
            continue
        if B // bt < min_steps:
            continue
        if step_bytes_fn(bt) <= vmem_budget:
            return bt
    return 1


# --------------------------------------------------------------------------
# Public entry point
# --------------------------------------------------------------------------
def patch_embedder(x, params, patch_size, *, batch_tile=None,
                   io_dtype=jnp.float32, out_dtype=jnp.float32,
                   out_layout="NCHW"):
    """x: (B, Cin, H, W) NCHW. Returns (B, hidden, H/p, W/p) (or NHWC)."""
    B, C, H, W = x.shape
    p = patch_size
    Hp, Wp = H // p, W // p
    Np, K = Hp * Wp, C * p * p
    Hd = params["conv_w"].shape[0]

    # Lane-dense padded sizes (lane axis multiple of 128) and sublane-friendly
    # patch count (multiple of 16 for bf16 packing).
    Kpad = _round_up(K, 128)
    Hdpad = _round_up(Hd, 128)
    Np_p = _round_up(Np, 16)

    x_bytes = jnp.dtype(io_dtype).itemsize
    o_bytes = jnp.dtype(out_dtype).itemsize

    vmem_cap = _vmem_capacity_bytes()
    vmem_budget = int(0.75 * vmem_cap)
    step_fn = lambda bt: _step_vmem_bytes(bt, Np_p, Kpad, Hdpad, x_bytes, o_bytes)
    Bt = _choose_batch_tile(B, step_fn, vmem_budget) if batch_tile is None else batch_tile
    assert B % Bt == 0, (B, Bt)
    vmem_limit = int(min(vmem_cap - (4 << 20),
                         max(32 << 20, int(1.25 * step_fn(Bt)))))

    # ----- trace-time glue: patchify, pad to lane/sublane-dense, fold biases.
    # (The zero-pads fuse into the patchify transpose copy under XLA.)
    x_p = _patchify(x.astype(jnp.float32), p)                         # (B, Np, K)
    x_p = jnp.pad(x_p, ((0, 0), (0, Np_p - Np), (0, Kpad - K)))
    x_p = x_p.astype(io_dtype)

    ln1w = _patchify(params["ln1_w"][None].astype(jnp.float32), p)[0]  # (Np, K)
    ln1b = _patchify(params["ln1_b"][None].astype(jnp.float32), p)[0]  # (Np, K)
    ln1w = jnp.pad(ln1w, ((0, Np_p - Np), (0, Kpad - K)))              # pads -> 0

    cw = params["conv_w"].reshape(Hd, K).T.astype(jnp.float32)         # (K, Hd)
    cb = params["conv_b"].astype(jnp.float32)                          # (Hd,)
    # Exact bias fold (f32, trace time): fb[n,h] = sum_k ln1b[n,k]*cw[k,h] + cb[h]
    fb = ln1b @ cw + cb[None, :]                                       # (Np, Hd)
    fb = jnp.pad(fb, ((0, Np_p - Np), (0, Hdpad - Hd)))                # pads -> 0
    cw_bf16 = jnp.pad(cw, ((0, Kpad - K), (0, Hdpad - Hd))).astype(jnp.bfloat16)

    ln2w = jnp.transpose(params["ln2_w"], (1, 2, 0)).reshape(Np, Hd).astype(jnp.float32)
    ln2b = jnp.transpose(params["ln2_b"], (1, 2, 0)).reshape(Np, Hd).astype(jnp.float32)
    ln2w = jnp.pad(ln2w, ((0, Np_p - Np), (0, Hdpad - Hd)))
    ln2b = jnp.pad(ln2b, ((0, Np_p - Np), (0, Hdpad - Hd)))            # pads -> 0

    kernel = functools.partial(
        _patch_embed_kernel,
        inv_n1=1.0 / float(Np * K),        # TRUE element counts (pads are zero)
        inv_n2=1.0 / float(Np * Hd),
    )

    def _call(single_buffer_params):
        def _const2(b):
            return (0, 0)
        param_kw = {}
        if single_buffer_params and hasattr(pl, "Buffered"):
            # Grid-invariant parameter blocks: single-buffer to free VMEM.
            param_kw = dict(pipeline_mode=pl.Buffered(1))
        grid_spec = pltpu.PrefetchScalarGridSpec(
            num_scalar_prefetch=0,
            grid=(B // Bt,),
            in_specs=[
                pl.BlockSpec((Bt, Np_p, Kpad), lambda b: (b, 0, 0)),      # x
                pl.BlockSpec((Np_p, Kpad), _const2, **param_kw),          # ln1 weight
                pl.BlockSpec((Kpad, Hdpad), _const2, **param_kw),         # conv weight
                pl.BlockSpec((Np_p, Hdpad), _const2, **param_kw),         # fused bias
                pl.BlockSpec((Np_p, Hdpad), _const2, **param_kw),         # ln2 weight
                pl.BlockSpec((Np_p, Hdpad), _const2, **param_kw),         # ln2 bias
            ],
            out_specs=pl.BlockSpec((Bt, Np_p, Hdpad), lambda b: (b, 0, 0)),
        )
        return pl.pallas_call(
            kernel,
            out_shape=jax.ShapeDtypeStruct((B, Np_p, Hdpad), out_dtype),
            grid_spec=grid_spec,
            compiler_params=pltpu.CompilerParams(
                dimension_semantics=("parallel",),
                vmem_limit_bytes=vmem_limit),
        )(x_p, ln1w, cw_bf16, fb, ln2w, ln2b)

    try:
        out = _call(True)
    except Exception:
        # Fallback if this jax build rejects pipeline_mode=pl.Buffered(1).
        out = _call(False)

    # Strip padding; one fused XLA copy produces the requested layout.
    out = out[:, :Np, :Hd].reshape(B, Hp, Wp, Hd)          # NHWC (reshape is free)
    if out_layout == "NCHW":
        out = jnp.transpose(out, (0, 3, 1, 2))             # match nn.Conv2d layout
    return out


# --------------------------------------------------------------------------
# Pure-JAX reference & self-test
# --------------------------------------------------------------------------
def _reference(x, params, p):
    """Pure-JAX f32 reference (same math as the module, real-valued analogue)."""
    mu = jnp.mean(x, axis=(1, 2, 3), keepdims=True)
    var = jnp.mean((x - mu) ** 2, axis=(1, 2, 3), keepdims=True)
    xh = (x - mu) / jnp.sqrt(var + EPS)
    xh = xh * params["ln1_w"][None] + params["ln1_b"][None]
    y = lax.conv_general_dilated(
        xh, params["conv_w"], window_strides=(p, p), padding="VALID",
        dimension_numbers=("NCHW", "OIHW", "NCHW"))
    y = y + params["conv_b"][None, :, None, None]
    mu2 = jnp.mean(y, axis=(1, 2, 3), keepdims=True)
    var2 = jnp.mean((y - mu2) ** 2, axis=(1, 2, 3), keepdims=True)
    yh = (y - mu2) / jnp.sqrt(var2 + EPS)
    return yh * params["ln2_w"][None] + params["ln2_b"][None]


if __name__ == "__main__":
    B, C, H, W = 2, 4, 16, 16
    patch = 4
    hidden = 32
    Hp, Wp = H // patch, W // patch

    key = jax.random.PRNGKey(0)
    ks = jax.random.split(key, 7)
    x = jax.random.normal(ks[0], (B, C, H, W), jnp.float32)
    params = {
        "ln1_w": jax.random.normal(ks[1], (C, H, W), jnp.float32) * 0.1 + 1.0,
        "ln1_b": jax.random.normal(ks[2], (C, H, W), jnp.float32) * 0.1,
        "conv_w": jax.random.normal(ks[3], (hidden, C, patch, patch), jnp.float32)
                  * (1.0 / (C * patch * patch) ** 0.5),
        "conv_b": jax.random.normal(ks[4], (hidden,), jnp.float32) * 0.1,
        "ln2_w": jax.random.normal(ks[5], (hidden, Hp, Wp), jnp.float32) * 0.1 + 1.0,
        "ln2_b": jax.random.normal(ks[6], (hidden, Hp, Wp), jnp.float32) * 0.1,
    }

    out = patch_embedder(x, params, patch)
    out = jax.block_until_ready(out)

    ref = _reference(x, params, patch)
    assert out.shape == (B, hidden, Hp, Wp), out.shape
    # bf16 MXU operands (f32 accumulate) -> looser tolerance vs the f32 reference.
    assert jnp.allclose(out, ref, atol=3e-2, rtol=3e-2), float(
        jnp.max(jnp.abs(out - ref)))
    print("KERNEL_OK")
</pallas_src>

<mosaic_0001>
module attributes {stable_mosaic.version = 11 : i64} {
  func.func @_patch_embed_kernel(%arg0: i32, %arg1: memref<1x16x128xf32, #tpu.memory_space<vmem>>, %arg2: memref<16x128xf32, #tpu.memory_space<vmem>>, %arg3: memref<128x128xbf16, #tpu.memory_space<vmem>>, %arg4: memref<16x128xf32, #tpu.memory_space<vmem>>, %arg5: memref<16x128xf32, #tpu.memory_space<vmem>>, %arg6: memref<16x128xf32, #tpu.memory_space<vmem>>, %arg7: memref<1x16x128xf32, #tpu.memory_space<vmem>>) attributes {dimension_semantics = [#tpu.dimension_semantics<parallel>], iteration_bounds = array<i64: 2>, scalar_prefetch = 0 : i64, scratch_operands = 0 : i64, tpu.core_type = #tpu.core_type<tc>, window_params = [{transform_indices = @transform_0, window_bounds = array<i64: 1, 16, 128>}, {pipeline_mode = #tpu.pipeline_mode<synchronous>, transform_indices = @transform_1, window_bounds = array<i64: 16, 128>}, {pipeline_mode = #tpu.pipeline_mode<synchronous>, transform_indices = @transform_2, window_bounds = array<i64: 128, 128>}, {pipeline_mode = #tpu.pipeline_mode<synchronous>, transform_indices = @transform_3, window_bounds = array<i64: 16, 128>}, {pipeline_mode = #tpu.pipeline_mode<synchronous>, transform_indices = @transform_4, window_bounds = array<i64: 16, 128>}, {pipeline_mode = #tpu.pipeline_mode<synchronous>, transform_indices = @transform_5, window_bounds = array<i64: 16, 128>}, {transform_indices = @transform_6, window_bounds = array<i64: 1, 16, 128>}]} {
    %c0 = arith.constant 0 : index
    %c0_0 = arith.constant 0 : index
    %c0_1 = arith.constant 0 : index
    %0 = vector.load %arg1[%c0, %c0_0, %c0_1] : memref<1x16x128xf32, #tpu.memory_space<vmem>>, vector<1x16x128xf32>
    %cst = arith.constant dense<0.000000e+00> : vector<1xf32>
    %1 = vector.multi_reduction <add>, %0, %cst [1, 2] : vector<1x16x128xf32> to vector<1xf32>
    %2 = vector.shape_cast %1 : vector<1xf32> to vector<1x1x1xf32>
    %3 = arith.mulf %0, %0 : vector<1x16x128xf32>
    %cst_2 = arith.constant dense<0.000000e+00> : vector<1xf32>
    %4 = vector.multi_reduction <add>, %3, %cst_2 [1, 2] : vector<1x16x128xf32> to vector<1xf32>
    %5 = vector.shape_cast %4 : vector<1xf32> to vector<1x1x1xf32>
    %cst_3 = arith.constant 9.765625E-4 : f32
    %6 = vector.broadcast %cst_3 : f32 to vector<1x1x1xf32>
    %7 = arith.mulf %2, %6 : vector<1x1x1xf32>
    %cst_4 = arith.constant 9.765625E-4 : f32
    %8 = vector.broadcast %cst_4 : f32 to vector<1x1x1xf32>
    %9 = arith.mulf %5, %8 : vector<1x1x1xf32>
    %10 = arith.mulf %7, %7 : vector<1x1x1xf32>
    %11 = arith.subf %9, %10 : vector<1x1x1xf32>
    %cst_5 = arith.constant 0.000000e+00 : f32
    %12 = vector.broadcast %cst_5 : f32 to vector<1x1x1xf32>
    %13 = arith.maximumf %11, %12 : vector<1x1x1xf32>
    %14 = vector.broadcast %7 : vector<1x1x1xf32> to vector<1x16x128xf32>
    %15 = arith.subf %0, %14 : vector<1x16x128xf32>
    %cst_6 = arith.constant 9.99999974E-6 : f32
    %16 = vector.broadcast %cst_6 : f32 to vector<1x1x1xf32>
    %17 = arith.addf %13, %16 : vector<1x1x1xf32>
    %18 = math.rsqrt %17 : vector<1x1x1xf32>
    %19 = vector.broadcast %18 : vector<1x1x1xf32> to vector<1x16x128xf32>
    %20 = arith.mulf %15, %19 : vector<1x16x128xf32>
    %c0_7 = arith.constant 0 : index
    %c0_8 = arith.constant 0 : index
    %21 = vector.load %arg2[%c0_7, %c0_8] : memref<16x128xf32, #tpu.memory_space<vmem>>, vector<16x128xf32>
    %22 = vector.shape_cast %21 : vector<16x128xf32> to vector<1x16x128xf32>
    %23 = arith.mulf %20, %22 : vector<1x16x128xf32>
    %24 = arith.truncf %23 : vector<1x16x128xf32> to vector<1x16x128xbf16>
    %25 = vector.shape_cast %24 : vector<1x16x128xbf16> to vector<16x128xbf16>
    %c0_9 = arith.constant 0 : index
    %c0_10 = arith.constant 0 : index
    %26 = vector.load %arg3[%c0_9, %c0_10] : memref<128x128xbf16, #tpu.memory_space<vmem>>, vector<128x128xbf16>
    %cst_11 = arith.constant dense<0.000000e+00> : vector<16x128xf32>
    %27 = tpu.matmul %25, %26, %cst_11 {dimension_numbers = #tpu.dot_dimension_numbers<[1], [0], [0], [1], [0, 0, 1, 1], [], []>} : vector<16x128xbf16>, vector<128x128xbf16>, vector<16x128xf32> -> vector<16x128xf32>
    %28 = vector.shape_cast %27 : vector<16x128xf32> to vector<1x16x128xf32>
    %c0_12 = arith.constant 0 : index
    %c0_13 = arith.constant 0 : index
    %29 = vector.load %arg4[%c0_12, %c0_13] : memref<16x128xf32, #tpu.memory_space<vmem>>, vector<16x128xf32>
    %30 = vector.shape_cast %29 : vector<16x128xf32> to vector<1x16x128xf32>
    %31 = arith.addf %28, %30 : vector<1x16x128xf32>
    %cst_14 = arith.constant dense<0.000000e+00> : vector<1xf32>
    %32 = vector.multi_reduction <add>, %31, %cst_14 [1, 2] : vector<1x16x128xf32> to vector<1xf32>
    %33 = vector.shape_cast %32 : vector<1xf32> to vector<1x1x1xf32>
    %34 = arith.mulf %31, %31 : vector<1x16x128xf32>
    %cst_15 = arith.constant dense<0.000000e+00> : vector<1xf32>
    %35 = vector.multi_reduction <add>, %34, %cst_15 [1, 2] : vector<1x16x128xf32> to vector<1xf32>
    %36 = vector.shape_cast %35 : vector<1xf32> to vector<1x1x1xf32>
    %cst_16 = arith.constant 0.001953125 : f32
    %37 = vector.broadcast %cst_16 : f32 to vector<1x1x1xf32>
    %38 = arith.mulf %33, %37 : vector<1x1x1xf32>
    %cst_17 = arith.constant 0.001953125 : f32
    %39 = vector.broadcast %cst_17 : f32 to vector<1x1x1xf32>
    %40 = arith.mulf %36, %39 : vector<1x1x1xf32>
    %41 = arith.mulf %38, %38 : vector<1x1x1xf32>
    %42 = arith.subf %40, %41 : vector<1x1x1xf32>
    %cst_18 = arith.constant 0.000000e+00 : f32
    %43 = vector.broadcast %cst_18 : f32 to vector<1x1x1xf32>
    %44 = arith.maximumf %42, %43 : vector<1x1x1xf32>
    %45 = vector.broadcast %38 : vector<1x1x1xf32> to vector<1x16x128xf32>
    %46 = arith.subf %31, %45 : vector<1x16x128xf32>
    %cst_19 = arith.constant 9.99999974E-6 : f32
    %47 = vector.broadcast %cst_19 : f32 to vector<1x1x1xf32>
    %48 = arith.addf %44, %47 : vector<1x1x1xf32>
    %49 = math.rsqrt %48 : vector<1x1x1xf32>
    %50 = vector.broadcast %49 : vector<1x1x1xf32> to vector<1x16x128xf32>
    %51 = arith.mulf %46, %50 : vector<1x16x128xf32>
    %c0_20 = arith.constant 0 : index
    %c0_21 = arith.constant 0 : index
    %52 = vector.load %arg5[%c0_20, %c0_21] : memref<16x128xf32, #tpu.memory_space<vmem>>, vector<16x128xf32>
    %53 = vector.shape_cast %52 : vector<16x128xf32> to vector<1x16x128xf32>
    %54 = arith.mulf %51, %53 : vector<1x16x128xf32>
    %c0_22 = arith.constant 0 : index
    %c0_23 = arith.constant 0 : index
    %55 = vector.load %arg6[%c0_22, %c0_23] : memref<16x128xf32, #tpu.memory_space<vmem>>, vector<16x128xf32>
    %56 = vector.shape_cast %55 : vector<16x128xf32> to vector<1x16x128xf32>
    %57 = arith.addf %54, %56 : vector<1x16x128xf32>
    %c0_24 = arith.constant 0 : index
    %c0_25 = arith.constant 0 : index
    %c0_26 = arith.constant 0 : index
    %58 = vector.load %arg7[%c0_24, %c0_25, %c0_26] : memref<1x16x128xf32, #tpu.memory_space<vmem>>, vector<1x16x128xf32>
    tpu.vector_store %arg7[%c0_24, %c0_25, %c0_26], %57 {strides = array<i32>} : memref<1x16x128xf32, #tpu.memory_space<vmem>>, vector<1x16x128xf32>,
    return
  }
  func.func @transform_0(%arg0: i32) -> (i32, i32, i32) {
    %c0_i32 = arith.constant 0 : i32
    %c0_i32_0 = arith.constant 0 : i32
    %c0_i32_1 = arith.constant 0 : i32
    return %arg0, %c0_i32, %c0_i32_0 : i32, i32, i32
  }
  func.func @transform_1(%arg0: i32) -> (i32, i32) {
    %c0_i32 = arith.constant 0 : i32
    %c0_i32_0 = arith.constant 0 : i32
    %c0_i32_1 = arith.constant 0 : i32
    return %c0_i32, %c0_i32_0 : i32, i32
  }
  func.func @transform_2(%arg0: i32) -> (i32, i32) {
    %c0_i32 = arith.constant 0 : i32
    %c0_i32_0 = arith.constant 0 : i32
    %c0_i32_1 = arith.constant 0 : i32
    return %c0_i32, %c0_i32_0 : i32, i32
  }
  func.func @transform_3(%arg0: i32) -> (i32, i32) {
    %c0_i32 = arith.constant 0 : i32
    %c0_i32_0 = arith.constant 0 : i32
    %c0_i32_1 = arith.constant 0 : i32
    return %c0_i32, %c0_i32_0 : i32, i32
  }
  func.func @transform_4(%arg0: i32) -> (i32, i32) {
    %c0_i32 = arith.constant 0 : i32
    %c0_i32_0 = arith.constant 0 : i32
    %c0_i32_1 = arith.constant 0 : i32
    return %c0_i32, %c0_i32_0 : i32, i32
  }
  func.func @transform_5(%arg0: i32) -> (i32, i32) {
    %c0_i32 = arith.constant 0 : i32
    %c0_i32_0 = arith.constant 0 : i32
    %c0_i32_1 = arith.constant 0 : i32
    return %c0_i32, %c0_i32_0 : i32, i32
  }
  func.func @transform_6(%arg0: i32) -> (i32, i32, i32) {
    %c0_i32 = arith.constant 0 : i32
    %c0_i32_0 = arith.constant 0 : i32
    %c0_i32_1 = arith.constant 0 : i32
    return %arg0, %c0_i32, %c0_i32_0 : i32, i32, i32
  }
}

module attributes {stable_mosaic.version = 11 : i64} {
  func.func @_patch_embed_kernel(%arg0: i32, %arg1: memref<1x16x128xf32, #tpu.memory_space<vmem>>, %arg2: memref<16x128xf32, #tpu.memory_space<vmem>>, %arg3: memref<128x128xbf16, #tpu.memory_space<vmem>>, %arg4: memref<16x128xf32, #tpu.memory_space<vmem>>, %arg5: memref<16x128xf32, #tpu.memory_space<vmem>>, %arg6: memref<16x128xf32, #tpu.memory_space<vmem>>, %arg7: memref<1x16x128xf32, #tpu.memory_space<vmem>>) attributes {dimension_semantics = [#tpu.dimension_semantics<parallel>], iteration_bounds = array<i64: 2>, scalar_prefetch = 0 : i64, scratch_operands = 0 : i64, tpu.core_type = #tpu.core_type<tc>, window_params = [{transform_indices = @transform_0, window_bounds = array<i64: 1, 16, 128>}, {pipeline_mode = #tpu.pipeline_mode<synchronous>, transform_indices = @transform_1, window_bounds = array<i64: 16, 128>}, {pipeline_mode = #tpu.pipeline_mode<synchronous>, transform_indices = @transform_2, window_bounds = array<i64: 128, 128>}, {pipeline_mode = #tpu.pipeline_mode<synchronous>, transform_indices = @transform_3, window_bounds = array<i64: 16, 128>}, {pipeline_mode = #tpu.pipeline_mode<synchronous>, transform_indices = @transform_4, window_bounds = array<i64: 16, 128>}, {pipeline_mode = #tpu.pipeline_mode<synchronous>, transform_indices = @transform_5, window_bounds = array<i64: 16, 128>}, {transform_indices = @transform_6, window_bounds = array<i64: 1, 16, 128>}]} {
    %c0 = arith.constant 0 : index
    %c0_0 = arith.constant 0 : index
    %c0_1 = arith.constant 0 : index
    %0 = vector.load %arg1[%c0, %c0_0, %c0_1] : memref<1x16x128xf32, #tpu.memory_space<vmem>>, vector<1x16x128xf32>
    %cst = arith.constant dense<0.000000e+00> : vector<1xf32>
    %1 = vector.multi_reduction <add>, %0, %cst [1, 2] : vector<1x16x128xf32> to vector<1xf32>
    %2 = vector.shape_cast %1 : vector<1xf32> to vector<1x1x1xf32>
    %3 = arith.mulf %0, %0 : vector<1x16x128xf32>
    %cst_2 = arith.constant dense<0.000000e+00> : vector<1xf32>
    %4 = vector.multi_reduction <add>, %3, %cst_2 [1, 2] : vector<1x16x128xf32> to vector<1xf32>
    %5 = vector.shape_cast %4 : vector<1xf32> to vector<1x1x1xf32>
    %cst_3 = arith.constant 9.765625E-4 : f32
    %6 = vector.broadcast %cst_3 : f32 to vector<1x1x1xf32>
    %7 = arith.mulf %2, %6 : vector<1x1x1xf32>
    %cst_4 = arith.constant 9.765625E-4 : f32
    %8 = vector.broadcast %cst_4 : f32 to vector<1x1x1xf32>
    %9 = arith.mulf %5, %8 : vector<1x1x1xf32>
    %10 = arith.mulf %7, %7 : vector<1x1x1xf32>
    %11 = arith.subf %9, %10 : vector<1x1x1xf32>
    %cst_5 = arith.constant 0.000000e+00 : f32
    %12 = vector.broadcast %cst_5 : f32 to vector<1x1x1xf32>
    %13 = arith.maximumf %11, %12 : vector<1x1x1xf32>
    %14 = vector.broadcast %7 : vector<1x1x1xf32> to vector<1x16x128xf32>
    %15 = arith.subf %0, %14 : vector<1x16x128xf32>
    %cst_6 = arith.constant 9.99999974E-6 : f32
    %16 = vector.broadcast %cst_6 : f32 to vector<1x1x1xf32>
    %17 = arith.addf %13, %16 : vector<1x1x1xf32>
    %18 = math.rsqrt %17 : vector<1x1x1xf32>
    %19 = vector.broadcast %18 : vector<1x1x1xf32> to vector<1x16x128xf32>
    %20 = arith.mulf %15, %19 : vector<1x16x128xf32>
    %c0_7 = arith.constant 0 : index
    %c0_8 = arith.constant 0 : index
    %21 = vector.load %arg2[%c0_7, %c0_8] : memref<16x128xf32, #tpu.memory_space<vmem>>, vector<16x128xf32>
    %22 = vector.shape_cast %21 : vector<16x128xf32> to vector<1x16x128xf32>
    %23 = arith.mulf %20, %22 : vector<1x16x128xf32>
    %24 = arith.truncf %23 : vector<1x16x128xf32> to vector<1x16x128xbf16>
    %25 = vector.shape_cast %24 : vector<1x16x128xbf16> to vector<16x128xbf16>
    %c0_9 = arith.constant 0 : index
    %c0_10 = arith.constant 0 : index
    %26 = vector.load %arg3[%c0_9, %c0_10] : memref<128x128xbf16, #tpu.memory_space<vmem>>, vector<128x128xbf16>
    %cst_11 = arith.constant dense<0.000000e+00> : vector<16x128xf32>
    %27 = tpu.matmul %25, %26, %cst_11 {dimension_numbers = #tpu.dot_dimension_numbers<[1], [0], [0], [1], [0, 0, 1, 1], [], []>} : vector<16x128xbf16>, vector<128x128xbf16>, vector<16x128xf32> -> vector<16x128xf32>
    %28 = vector.shape_cast %27 : vector<16x128xf32> to vector<1x16x128xf32>
    %c0_12 = arith.constant 0 : index
    %c0_13 = arith.constant 0 : index
    %29 = vector.load %arg4[%c0_12, %c0_13] : memref<16x128xf32, #tpu.memory_space<vmem>>, vector<16x128xf32>
    %30 = vector.shape_cast %29 : vector<16x128xf32> to vector<1x16x128xf32>
    %31 = arith.addf %28, %30 : vector<1x16x128xf32>
    %cst_14 = arith.constant dense<0.000000e+00> : vector<1xf32>
    %32 = vector.multi_reduction <add>, %31, %cst_14 [1, 2] : vector<1x16x128xf32> to vector<1xf32>
    %33 = vector.shape_cast %32 : vector<1xf32> to vector<1x1x1xf32>
    %34 = arith.mulf %31, %31 : vector<1x16x128xf32>
    %cst_15 = arith.constant dense<0.000000e+00> : vector<1xf32>
    %35 = vector.multi_reduction <add>, %34, %cst_15 [1, 2] : vector<1x16x128xf32> to vector<1xf32>
    %36 = vector.shape_cast %35 : vector<1xf32> to vector<1x1x1xf32>
    %cst_16 = arith.constant 0.001953125 : f32
    %37 = vector.broadcast %cst_16 : f32 to vector<1x1x1xf32>
    %38 = arith.mulf %33, %37 : vector<1x1x1xf32>
    %cst_17 = arith.constant 0.001953125 : f32
    %39 = vector.broadcast %cst_17 : f32 to vector<1x1x1xf32>
    %40 = arith.mulf %36, %39 : vector<1x1x1xf32>
    %41 = arith.mulf %38, %38 : vector<1x1x1xf32>
    %42 = arith.subf %40, %41 : vector<1x1x1xf32>
    %cst_18 = arith.constant 0.000000e+00 : f32
    %43 = vector.broadcast %cst_18 : f32 to vector<1x1x1xf32>
    %44 = arith.maximumf %42, %43 : vector<1x1x1xf32>
    %45 = vector.broadcast %38 : vector<1x1x1xf32> to vector<1x16x128xf32>
    %46 = arith.subf %31, %45 : vector<1x16x128xf32>
    %cst_19 = arith.constant 9.99999974E-6 : f32
    %47 = vector.broadcast %cst_19 : f32 to vector<1x1x1xf32>
    %48 = arith.addf %44, %47 : vector<1x1x1xf32>
    %49 = math.rsqrt %48 : vector<1x1x1xf32>
    %50 = vector.broadcast %49 : vector<1x1x1xf32> to vector<1x16x128xf32>
    %51 = arith.mulf %46, %50 : vector<1x16x128xf32>
    %c0_20 = arith.constant 0 : index
    %c0_21 = arith.constant 0 : index
    %52 = vector.load %arg5[%c0_20, %c0_21] : memref<16x128xf32, #tpu.memory_space<vmem>>, vector<16x128xf32>
    %53 = vector.shape_cast %52 : vector<16x128xf32> to vector<1x16x128xf32>
    %54 = arith.mulf %51, %53 : vector<1x16x128xf32>
    %c0_22 = arith.constant 0 : index
    %c0_23 = arith.constant 0 : index
    %55 = vector.load %arg6[%c0_22, %c0_23] : memref<16x128xf32, #tpu.memory_space<vmem>>, vector<16x128xf32>
    %56 = vector.shape_cast %55 : vector<16x128xf32> to vector<1x16x128xf32>
    %57 = arith.addf %54, %56 : vector<1x16x128xf32>
    %c0_24 = arith.constant 0 : index
    %c0_25 = arith.constant 0 : index
    %c0_26 = arith.constant 0 : index
    %58 = vector.load %arg7[%c0_24, %c0_25, %c0_26] : memref<1x16x128xf32, #tpu.memory_space<vmem>>, vector<1x16x128xf32>
    tpu.vector_store %arg7[%c0_24, %c0_25, %c0_26], %57 {strides = array<i32>} : memref<1x16x128xf32, #tpu.memory_space<vmem>>, vector<1x16x128xf32>,
    return
  }
  func.func @transform_0(%arg0: i32) -> (i32, i32, i32) {
    %c0_i32 = arith.constant 0 : i32
    %c0_i32_0 = arith.constant 0 : i32
    %c0_i32_1 = arith.constant 0 : i32
    return %arg0, %c0_i32, %c0_i32_0 : i32, i32, i32
  }
  func.func @transform_1(%arg0: i32) -> (i32, i32) {
    %c0_i32 = arith.constant 0 : i32
    %c0_i32_0 = arith.constant 0 : i32
    %c0_i32_1 = arith.constant 0 : i32
    return %c0_i32, %c0_i32_0 : i32, i32
  }
  func.func @transform_2(%arg0: i32) -> (i32, i32) {
    %c0_i32 = arith.constant 0 : i32
    %c0_i32_0 = arith.constant 0 : i32
    %c0_i32_1 = arith.constant 0 : i32
    return %c0_i32, %c0_i32_0 : i32, i32
  }
  func.func @transform_3(%arg0: i32) -> (i32, i32) {
    %c0_i32 = arith.constant 0 : i32
    %c0_i32_0 = arith.constant 0 : i32
    %c0_i32_1 = arith.constant 0 : i32
    return %c0_i32, %c0_i32_0 : i32, i32
  }
  func.func @transform_4(%arg0: i32) -> (i32, i32) {
    %c0_i32 = arith.constant 0 : i32
    %c0_i32_0 = arith.constant 0 : i32
    %c0_i32_1 = arith.constant 0 : i32
    return %c0_i32, %c0_i32_0 : i32, i32
  }
  func.func @transform_5(%arg0: i32) -> (i32, i32) {
    %c0_i32 = arith.constant 0 : i32
    %c0_i32_0 = arith.constant 0 : i32
    %c0_i32_1 = arith.constant 0 : i32
    return %c0_i32, %c0_i32_0 : i32, i32
  }
  func.func @transform_6(%arg0: i32) -> (i32, i32, i32) {
    %c0_i32 = arith.constant 0 : i32
    %c0_i32_0 = arith.constant 0 : i32
    %c0_i32_1 = arith.constant 0 : i32
    return %arg0, %c0_i32, %c0_i32_0 : i32, i32, i32
  }
}

</mosaic_0001>

<bundles_post_ra>
// kernel: tpu_custom_call.1
= control target key start
LH: loop header
LB: loop body
LE: loop exit
PB: predicated region body
PF: predicated region fallthrough
CT: control target
= control target key end

     0   :  { %11 = vsyncpa [#allocation3], 0  ;;  %s1383_s0 = inlined_call_operand.hbm [shape: f32[2,16,128], index: 0, kind: input, shape index: {}]   ;;  %s1384_s1 = inlined_call_operand.hbm [shape: f32[16,128], index: 1, kind: input, shape index: {}]   ;;  %s1385_s2 = inlined_call_operand.hbm [shape: bf16[128,128], index: 2, kind: input, shape index: {}]   ;;  %s1386_s3 = inlined_call_operand.hbm [shape: f32[16,128], index: 3, kind: input, shape index: {}]   ;;  %s1387_s4 = inlined_call_operand.hbm [shape: f32[16,128], index: 4, kind: input, shape index: {}]   ;;  %s1388_s5 = inlined_call_operand.hbm [shape: f32[16,128], index: 5, kind: input, shape index: {}]   ;;  %s1389_s6 = inlined_call_operand.hbm [shape: f32[2,16,128], index: 6, kind: output, shape index: {}]  }
   0x1   :  { %13 = vsyncpa [#allocation3 + $0x1], 0 }
   0x2   :  { %14 = vsyncpa [#allocation6], 0 }
   0x3   :  { %15 = vsyncpa [#allocation9], 0 }
   0x4   :  { %16 = vsyncpa [#allocation12], 0 }
   0x5   :  { %17 = vsyncpa [#allocation4], 0 }
   0x6   :  { %19 = vsyncpa [#allocation4 + $0x1], 0  ;;  %s1133_s21 = smov 0   ;;  %s1135_s22 = smov 0  }
   0x7   :  { %s1137_s23 = smov 0   ;;  %s1139_s24 = smov 0  }
   0x8 LB: > { %s1083_s25 = smov [#allocation5]   ;;  %s1154_s27 = sadd.s32 4294967295, %s1081_s24   ;;  %s1081_s24 = sphi %s1139_s24, %s1419_s24   ;;  %s1077_s23 = sphi %s1137_s23, %s1418_s23   ;;  %s1073_s22 = sphi %s1135_s22, %s1417_s22   ;;  %s1069_s21 = sphi %s1133_s21, %s1416_s21  }
   0x9   : > { %s199_s26 = sshll.u32 %s1083_s25, 4  ;;  %p668_p0 = scmp.ge.s32.totalorder %s1081_s24, 1  ;;  %s200_s26 = int_to_ptr.vmem [resolvable:$true] %s199_s26 }
   0xa   : > { %p1390_p1 = scmp.eq.s32.totalorder %s1154_s27, 0  ;;  %p187_p2 = scmp.lt.s32.totalorder %s1081_s24, 3 }
   0xb   : > { %s1084_s29 = smov [#allocation8]   ;;  %s1085_s8 = smov [#allocation7]  }
   0xc   : > { %p1159_p3 = pnand %p668_p0, %p187_p2  ;;  %s225_s30 = sshll.u32 %s1084_s29, 4  ;;  %s1172_s30 = int_to_ptr.vmem [resolvable:$true] %s225_s30 }
   0xd   : > { %s212_s9 = sshll.u32 %s1085_s8, 4  ;;  %s858_s11 = scalar_lea.vmem %s200_s26, 256  ;;  %s1174_s9 = int_to_ptr.vmem [resolvable:$true] %s212_s9 }
   0xe   : > { %s1396_s28 = scalar_select %p1159_p3, 1, 0 }
   0xf   : > { %p754_p5 = pneg %p1159_p3  ;;  %p859_p8 = scmp.ne.s32.totalorder %s200_s26, %s858_s11 }
  0x10   : > { %p866_p11 = scmp.lt.s32.totalorder %s200_s26, %s200_s26  ;;  %p867_p12 = scmp.lt.s32.totalorder %s858_s11, %s858_s11 }
  0x11   : > { %p1168_p6 = pnand %p754_p5, %p1390_p1 }
  0x12   : > { %p868_p13 = por %p867_p12, %p866_p11 }
  0x13   : > { %p1178_p7 = pneg %p1168_p6 }
  0x15   : > { %p861_p9 = pnand %p859_p8, %p1178_p7 }
  0x17   : > { %p862_p10 = pneg %p861_p9 }
  0x19   : > { %p869_p0 = pnand %p868_p13, %p862_p10 }
  0x1b   : > { %872 = shalt.err (!%p869_p0)
}
  0x1c   : > { %s1391_s12 = smov 128   ;;  %s1392_s13 = smov 8  }
  0x1d   : > { %757 = dma.hbm_to_vmem [thread:$0]  (!%p1168_p6), %s1384_s1, 256, %s200_s26, [#allocation6], %s1391_s12, %s1391_s12, %s1392_s13  }
  0x1e   : > { %s884_s16 = scalar_lea.vmem %s1172_s30, 256  ;;  %p892_p9 = scmp.lt.s32.totalorder %s1172_s30, %s1172_s30 }
  0x1f   : > { %p885_p2 = scmp.ne.s32.totalorder %s1172_s30, %s884_s16  ;;  %p893_p10 = scmp.lt.s32.totalorder %s884_s16, %s884_s16 }
  0x21   : > { %p887_p5 = pnand %p885_p2, %p1178_p7  ;;  %p894_p11 = por %p893_p10, %p892_p9 }
  0x23   : > { %p888_p8 = pneg %p887_p5 }
  0x25   : > { %p895_p12 = pnand %p894_p11, %p888_p8 }
  0x27   : > { %898 = shalt.err (!%p895_p12)
}
  0x28   : > { %763 = dma.hbm_to_vmem [thread:$0]  (!%p1168_p6), %s1386_s3, 256, %s1172_s30, [#allocation9], %s1391_s12, %s1391_s12, %s1392_s13  }
  0x29   : > { %s910_s19 = scalar_lea.vmem %s1174_s9, 1024  ;;  %p918_p5 = scmp.lt.s32.totalorder %s1174_s9, %s1174_s9 }
  0x2a   : > { %p911_p13 = scmp.ne.s32.totalorder %s1174_s9, %s910_s19  ;;  %p919_p8 = scmp.lt.s32.totalorder %s910_s19, %s910_s19 }
  0x2c   : > { %p913_p0 = pnand %p911_p13, %p1178_p7  ;;  %p920_p9 = por %p919_p8, %p918_p5 }
  0x2e   : > { %p914_p2 = pneg %p913_p0 }
  0x30   : > { %p921_p10 = pnand %p920_p9, %p914_p2 }
  0x32   : > { %924 = shalt.err (!%p921_p10)
}
  0x33   : > { %s1088_s20 = smov 64   ;;  %s1089_s25 = smov 4  }
  0x34   : > { %760 = dma.hbm_to_vmem [thread:$0]  (!%p1168_p6), %s1385_s2, 1024, %s1174_s9, [#allocation6], %s1088_s20, %s1088_s20, %s1089_s25  }
  0x35   : > { %s1090_s30 = smov [#allocation10]   ;;  %s1091_s11 = smov [#allocation11]  }
  0x36   : > { %s238_s8 = sshll.u32 %s1090_s30, 4  ;;  %s251_s14 = sshll.u32 %s1091_s11, 4  ;;  %s239_s8 = int_to_ptr.vmem [resolvable:$true] %s238_s8  ;;  %s252_s14 = int_to_ptr.vmem [resolvable:$true] %s251_s14 }
  0x37   : > { %s936_s15 = scalar_lea.vmem %s239_s8, 256  ;;  %p944_p0 = scmp.lt.s32.totalorder %s239_s8, %s239_s8 }
  0x38   : > { %p937_p11 = scmp.ne.s32.totalorder %s239_s8, %s936_s15  ;;  %p945_p2 = scmp.lt.s32.totalorder %s936_s15, %s936_s15 }
  0x3a   : > { %p939_p12 = pnand %p937_p11, %p1178_p7  ;;  %p946_p5 = por %p945_p2, %p944_p0 }
  0x3c   : > { %p940_p13 = pneg %p939_p12 }
  0x3e   : > { %p947_p8 = pnand %p946_p5, %p940_p13 }
  0x40   : > { %950 = shalt.err (!%p947_p8)
}
  0x41   : > { %766 = dma.hbm_to_vmem [thread:$0]  (!%p1168_p6), %s1387_s4, 256, %s239_s8, [#allocation9], %s1391_s12, %s1391_s12, %s1392_s13  }
  0x42   : > { %s962_s17 = scalar_lea.vmem %s252_s14, 256  ;;  %p970_p12 = scmp.lt.s32.totalorder %s252_s14, %s252_s14 }
  0x43   : > { %p963_p9 = scmp.ne.s32.totalorder %s252_s14, %s962_s17  ;;  %p971_p0 = scmp.lt.s32.totalorder %s962_s17, %s962_s17 }
  0x45   : > { %p965_p10 = pnand %p963_p9, %p1178_p7  ;;  %p972_p13 = por %p971_p0, %p970_p12 }
  0x47   : > { %p966_p11 = pneg %p965_p10 }
  0x49   : > { %p973_p2 = pnand %p972_p13, %p966_p11 }
  0x4b   : > { %976 = shalt.err (!%p973_p2)
}
  0x4c   : > { %769 = dma.hbm_to_vmem [thread:$0]  (!%p1168_p6), %s1388_s5, 256, %s252_s14, [#allocation12], %s1391_s12, %s1391_s12, %s1392_s13  }
  0x4d   : > { %s667_s7 = sadd.s32 4294967294, %s1081_s24   ;;  %s1241_s10 = sadd.s32 1, %s1081_s24  }
  0x4e   : > { %s32_s20 = sadd.s32 1, %s1077_s23  ;;  %s29_s25 = ssub.s32 %s1081_s24, %s1241_s10 }
  0x4f   : > { %p39_p7 = scmp.ne.s32.totalorder %s1077_s23, %s1073_s22  ;;  %p30_p5 = scmp.eq.s32.totalorder %s29_s25, 0 }
  0x50   : > { %p40_p8 = scmp.eq.s32.totalorder %s1081_s24, 0  ;;  %p45_p9 = scmp.ne.s32.totalorder %s1073_s22, %s1069_s21 }
  0x51   : > { %p174_p10 = scmp.eq.s32.totalorder %s1154_s27, 1  ;;  %p180_p0 = scmp.eq.s32.totalorder %s667_s7, 1 }
  0x52   : > { %s1253_s26 = scalar_select %p30_p5, %s1077_s23, %s32_s20  }
  0x53   : > { %p41_p11 = por %p40_p8, %p39_p7  ;;  %p1257_p12 = por %p1390_p1, %p45_p9 }
  0x54   : > { %p1261_p6 = por %p174_p10, %p39_p7  ;;  %p783_p13 = scmp.lt.s32.totalorder %s1081_s24, 2 }
  0x55   : > { %s1399_s29 = scalar_select %p1257_p12, 1, 0 }
  0x56   : > { %s1400_s30 = scalar_select %p1261_p6, 1, 0 }
  0x57   : > { %s265_s8 = sand.u32 1, %s1077_s23   ;;  %p1267_p2 = por %p180_p0, %p45_p9 }
  0x58   : > { %s675_s14 = sshll.u32 %s265_s8, 4  ;;  %s699_s15 = sshll.u32 %s1081_s24, 8 }
  0x59   : > { %s1401_s11 = scalar_select %p1267_p2, 1, 0 }
  0x5a   : > { %s1275_s17 = scalar_lea.hbm %s1383_s0, %s699_s15  ;;  %s269_s18 = scalar_lea.vmem [#allocation2], %s675_s14 }
  0x5b   : > { %s276_s19 = sshll.u32 %s269_s18, 4  ;;  %p1277_p7 = pnand %p783_p13, %p41_p11  ;;  %s1281_s19 = int_to_ptr.vmem [resolvable:$true] %s276_s19 }
  0x5c   : > { %s1283_s20 = scalar_lea.sflag [#allocation3], %s265_s8  ;;  %s977_s25 = scalar_lea.hbm %s1275_s17, 256 }
  0x5d   : > { %p978_p5 = scmp.ne.s32.totalorder %s1275_s17, %s977_s25  ;;  %p979_p8 = pneg %p1277_p7 }
  0x5e   : > { %s982_s14 = scalar_lea.hbm %s1383_s0, 512  ;;  %p983_p11 = scmp.lt.s32.totalorder %s1275_s17, %s1383_s0 }
  0x5f   : > { %p980_p9 = pnand %p979_p8, %p978_p5  ;;  %p984_p0 = scmp.lt.s32.totalorder %s982_s14, %s977_s25 }
  0x61   : > { %p981_p10 = pneg %p980_p9  ;;  %p985_p13 = por %p984_p0, %p983_p11 }
  0x63   : > { %p986_p4 = pnand %p985_p13, %p981_p10 }
  0x65   : > { %989 = shalt.err (!%p986_p4)
}
  0x66   : > { %s990_s8 = scalar_lea.vmem %s1281_s19, 256  ;;  %s1092_s12 = smov [#allocation2]  }
  0x67   : > { %p991_p1 = scmp.ne.s32.totalorder %s1281_s19, %s990_s8  ;;  %s995_s13 = sshll.u32 %s1092_s12, 4  ;;  %s996_s13 = int_to_ptr.vmem [resolvable:$false] %s995_s13 }
  0x68   : > { %s997_s15 = scalar_lea.vmem %s996_s13, 512  ;;  %p998_p9 = scmp.lt.s32.totalorder %s1281_s19, %s996_s13 }
  0x69   : > { %p993_p2 = pnand %p991_p1, %p979_p8  ;;  %p999_p6 = scmp.lt.s32.totalorder %s997_s15, %s990_s8 }
  0x6b   : > { %p994_p5 = pneg %p993_p2  ;;  %p1000_p12 = por %p999_p6, %p998_p9 }
  0x6d   : > { %p1001_p3 = pnand %p1000_p12, %p994_p5 }
  0x6f   : > { %1004 = shalt.err (!%p1001_p3)
}
  0x70   : > { %s1403_s25 = smov 8   ;;  %s1404_s9 = smov 128  }
  0x71   : > { %773 = dma.hbm_to_vmem [thread:$0]  (!%p1277_p7), %s1275_s17, 256, %s1281_s19, %s1283_s20, %s1404_s9, %s1404_s9, %s1403_s25  }
  0x72   : > { %p1405_p1 = scmp.ne.s32.totalorder %s1396_s28, 0 }
  0x73   : > { %s1310_s12 = sand.u32 (!%p1405_p1), 1, %s1073_s22   ;;  %p1406_p3 = scmp.ne.s32.totalorder (!%p1405_p1), %s1399_s29, 0 }
  0x74   : > { %288 = sbr.rel (%p1405_p1) target bundleno = 714 (0x2ca), region = 44  ;;  %s679_s13 = sshll.u32 (!%p1405_p1), %s1310_s12, 4 }
  0x75   : > { %s291_s14 = scalar_lea.sflag (!%p1405_p1), [#allocation3], %s1310_s12  ;;  %s294_s7 = scalar_lea.vmem (!%p1405_p1), [#allocation2], %s679_s13 }
  0x79   : > { %1048 = dma.done.wait (%p1406_p3), %s291_s14, 256  }
  0x7a   : > { %1050 = vsyncadd (%p1406_p3), %s291_s14, 4294967040  ;;  %p1407_p4 = scmp.eq.s32.totalorder %s1154_s27, 0 }
  0x7c   : > { %1052 = dma.done.wait (%p1407_p4), [#allocation6], 1280   ;;  %p1408_p12 = pmov %p1407_p4 }
  0x7d   : > { %p1409_p6 = pmov %p1407_p4 }
  0x7e   : > { %1054 = vsyncadd (%p1408_p12), [#allocation6], 4294966016 }
  0x7f   : > { %1056 = dma.done.wait (%p1409_p6), [#allocation9], 512   ;;  %p1410_p2 = pmov %p1407_p4 }
  0x81   : > { %1058 = vsyncadd (%p1410_p2), [#allocation9], 4294966784  ;;  %p1411_p7 = pmov %p1410_p2 }
  0x82   : > { %p1412_p8 = pmov %p1410_p2 }
  0x83   : > { %1060 = dma.done.wait (%p1411_p7), [#allocation12], 256  }
  0x84   : > { %1062 = vsyncadd (%p1412_p8), [#allocation12], 4294967040  ;;  %v344_v0 = vld [vmem:[%s294_s7] sm:$0xff]  ;;  %v345_v1 = vld [vmem:[%s294_s7 + $0x8] sm:$0xff]  ;;  %v1093_v7 = vmov 0.0   ;;  %vm1094_vm0 = vmmov 0  }
  0x85   : > { %v346_v2 = vadd.f32 %v345_v1, %v344_v0  ;;  %v355_v3 = vmul.f32 %v344_v0, %v344_v0  ;;  %v356_v4 = vmul.f32 %v345_v1, %v345_v1  ;;  %v835_v6 = vld [vmem:[#allocation7 + $0x38] sm:$0xff]   ;;  %710 = vmatprep.subr.bf16.mxu0 %v1093_v7  ;;  %v836_v8 = vld [vmem:[#allocation7 + $0x30] sm:$0xff]   ;;  %v837_v9 = vld [vmem:[#allocation7 + $0x28] sm:$0xff]   ;;  %726 = vmatprep.mubr.msk.bf16.mxu0 %vm1094_vm0, %v1093_v7  ;;  %s700_s28 = sshll.u32 %s1154_s27, 8  ;;  %s342_s29 = scalar_lea.vmem [#allocation13], %s679_s13 }
  0x86   : > { %711 = vmatpush3.bf16.msra.mxu0 %v835_v6  ;;  %v838_v10 = vld [vmem:[#allocation7 + $0x20] sm:$0xff]   ;;  %v839_v11 = vld [vmem:[#allocation7 + $0x18] sm:$0xff]   ;;  %v840_v12 = vld [vmem:[#allocation7 + $0x10] sm:$0xff]   ;;  %s546_s17 = sshll.u32 %s342_s29, 4  ;;  %s1338_s16 = scalar_lea.hbm %s1389_s6, %s700_s28  ;;  %s1340_s17 = int_to_ptr.vmem [resolvable:$true] %s546_s17 }
  0x87   : > { %347 = vadd.xlane.f32.xlu0 %v346_v2  ;;  %v357_v5 = vadd.f32 %v356_v4, %v355_v3  ;;  %712 = vmatprep.subr.bf16.mxu0 %v1093_v7  ;;  %v841_v13 = vld [vmem:[#allocation7 + $0x8] sm:$0xff]   ;;  %v842_v14 = vld [vmem:[#allocation7] sm:$0xff]   ;;  %v377_v38 = vld [vmem:[#allocation5] sm:$0xff]  ;;  %s533_s27 = scalar_lea.sflag [#allocation4], %s1310_s12  ;;  %s1005_s18 = scalar_lea.vmem %s1340_s17, 256 }
  0x88   : > { %v378_v39 = vld [vmem:[#allocation5 + $0x8] sm:$0xff]  ;;  %v487_v46 = vld [vmem:[#allocation8] sm:$0xff]  ;;  %v488_v48 = vld [vmem:[#allocation8 + $0x8] sm:$0xff]  ;;  %p1006_p10 = scmp.ne.s32.totalorder %s1340_s17, %s1005_s18  ;;  %p1413_p11 = scmp.ne.s32.totalorder %s1400_s30, 0 }
  0x89   : > { %s1095_s8 = smov [#allocation13]  }
  0x8a   : > { %713 = vmatpush3.bf16.msra.mxu0 %v836_v8  ;;  %p1007_p0 = pnand %p1006_p10, %p1413_p11  ;;  %s1009_s15 = sshll.u32 %s1095_s8, 4  ;;  %s1010_s15 = int_to_ptr.vmem [resolvable:$false] %s1009_s15 }
  0x8b   : > { %358 = vadd.xlane.f32.xlu0 %v357_v5  ;;  %714 = vmatprep.subr.bf16.mxu0 %v1093_v7  ;;  %s1011_s25 = scalar_lea.vmem %s1010_s15, 512  ;;  %p1012_p5 = scmp.lt.s32.totalorder %s1340_s17, %s1010_s15 }
  0x8c   : > { %p1008_p13 = pneg %p1007_p0  ;;  %p1013_p9 = scmp.lt.s32.totalorder %s1011_s25, %s1005_s18 }
  0x8e   : > { %715 = vmatpush3.bf16.msra.mxu0 %v837_v9  ;;  %p1014_p1 = por %p1013_p9, %p1012_p5 }
  0x8f   : > { %716 = vmatprep.subr.bf16.mxu0 %v1093_v7 }
  0x90   : > { %p1015_p3 = pnand %p1014_p1, %p1008_p13 }
  0x92   : > { %717 = vmatpush3.bf16.msra.mxu0 %v838_v10 }
  0x93   : > { %718 = vmatprep.subr.bf16.mxu0 %v1093_v7 }
  0x96   : > { %719 = vmatpush3.bf16.msra.mxu0 %v839_v11 }
  0x97   : > { %720 = vmatprep.subr.bf16.mxu0 %v1093_v7 }
  0x9a   : > { %721 = vmatpush3.bf16.msra.mxu0 %v840_v12 }
  0x9b   : > { %722 = vmatprep.subr.bf16.mxu0 %v1093_v7 }
  0x9e   : > { %723 = vmatpush3.bf16.msra.mxu0 %v841_v13 }
  0x9f   : > { %724 = vmatprep.subr.bf16.mxu0 %v1093_v7 }
  0xa2   : > { %725 = vmatpush3.bf16.msra.mxu0 %v842_v14 }
 0x110   : > { %v348_v15 = vpop.xlane.xlu0 %347 }
 0x111   : > { %v349_v16 = vrot.slane %v348_v15, 4 }
 0x113   : > { %v350_v17 = vadd.f32 %v349_v16, %v348_v15  ;;  %v522_v16 = vld [vmem:[#allocation10] sm:$0xff] }
 0x114   : > { %v359_v18 = vpop.xlane.xlu0 %358 }
 0x115   : > { %v351_v19 = vrot.slane %v350_v17, 2  ;;  %v360_v20 = vrot.slane %v359_v18, 4 }
 0x117   : > { %v352_v21 = vadd.f32 %v351_v19, %v350_v17  ;;  %v361_v22 = vadd.f32 %v360_v20, %v359_v18  ;;  %v523_v17 = vld [vmem:[#allocation10 + $0x8] sm:$0xff]  ;;  %v526_v20 = vld [vmem:[#allocation11] sm:$0xff] }
 0x119   : > { %v353_v23 = vrot.slane %v352_v21, 1  ;;  %v362_v24 = vrot.slane %v361_v22, 2 }
 0x11b   : > { %v354_v25 = vadd.f32 %v353_v23, %v352_v21  ;;  %v363_v26 = vadd.f32 %v362_v24, %v361_v22  ;;  %v527_v21 = vld [vmem:[#allocation11 + $0x8] sm:$0xff] }
 0x11d   : > { %v366_v27 = vmul.f32 0.0009765625, %v354_v25  ;;  %v364_v28 = vrot.slane %v363_v26, 1 }
 0x11f   : > { %v365_v29 = vadd.f32 %v364_v28, %v363_v26  ;;  %v368_v30 = vmul.f32 %v366_v27, %v366_v27  ;;  %v371_v35 = vsub.f32 %v344_v0, %v366_v27  ;;  %v372_v36 = vsub.f32 %v345_v1, %v366_v27 }
 0x121   : > { %v367_v31 = vmul.f32 0.0009765625, %v365_v29 }
 0x123   : > { %v369_v32 = vsub.f32 %v367_v31, %v368_v30 }
 0x125   : > { %v370_v33 = vmax.f32 %v369_v32, 0.0 }
 0x127   : > { %v373_v34 = vadd.f32 1e-05, %v370_v33 }
 0x129   : > { %843 = vrsqrt.f32 %v373_v34 }
 0x136   : > { %v844_v37 = vpop.eup %843 }
 0x137   : > { %v375_v40 = vmul.f32 %v844_v37, %v371_v35  ;;  %v376_v41 = vmul.f32 %v844_v37, %v372_v36 }
 0x139   : > { %v379_v42 = vmul.f32 %v377_v38, %v375_v40  ;;  %v380_v43 = vmul.f32 %v378_v39, %v376_v41 }
 0x13b   : > { %v381_v44 = vpack.c.bf16 %v380_v43, %v379_v42 }
 0x13d   : > { %727 = vmatmul.mubr.bf16.vlgmr.msra.gmra.mxu0 %v381_v44 }
 0x1fd   : > { %v480_v45 = vpop.f32.mrf.mxu0 }
 0x1fe   : > { %v489_v50 = vadd.f32 %v487_v46, %v480_v45 }
 0x1ff   : > { %v728_v47 = vpop.f32.mrf.mxu0 }
 0x200   : > { %v500_v55 = vmul.f32 %v489_v50, %v489_v50 }
 0x201   : > { %v483_v49 = vpop.f32.mrf.mxu0 }
 0x202   : > { %v490_v51 = vadd.f32 %v488_v48, %v483_v49 }
 0x203   : > { %v729_v52 = vpop.f32.mrf.mxu0 }
 0x204   : > { %v491_v53 = vadd.f32 %v490_v51, %v489_v50  ;;  %v501_v54 = vmul.f32 %v490_v51, %v490_v51 }
 0x206   : > { %492 = vadd.xlane.f32.xlu1 %v491_v53  ;;  %v502_v56 = vadd.f32 %v501_v54, %v500_v55 }
 0x20a   : > { %503 = vadd.xlane.f32.xlu1 %v502_v56 }
 0x28f   : > { %v493_v57 = vpop.xlane.xlu1 %492 }
 0x290   : > { %v494_v58 = vrot.slane %v493_v57, 4 }
 0x292   : > { %v495_v59 = vadd.f32 %v494_v58, %v493_v57 }
 0x293   : > { %v504_v60 = vpop.xlane.xlu1 %503 }
 0x294   : > { %v496_v61 = vrot.slane %v495_v59, 2  ;;  %v505_v62 = vrot.slane %v504_v60, 4 }
 0x296   : > { %v497_v63 = vadd.f32 %v496_v61, %v495_v59  ;;  %v506_v0 = vadd.f32 %v505_v62, %v504_v60 }
 0x298   : > { %v498_v1 = vrot.slane %v497_v63, 1  ;;  %v507_v2 = vrot.slane %v506_v0, 2 }
 0x29a   : > { %v499_v3 = vadd.f32 %v498_v1, %v497_v63  ;;  %v508_v4 = vadd.f32 %v507_v2, %v506_v0 }
 0x29c   : > { %v511_v5 = vmul.f32 0.001953125, %v499_v3  ;;  %v509_v6 = vrot.slane %v508_v4, 1 }
 0x29e   : > { %v510_v7 = vadd.f32 %v509_v6, %v508_v4  ;;  %v513_v8 = vmul.f32 %v511_v5, %v511_v5  ;;  %v516_v13 = vsub.f32 %v489_v50, %v511_v5  ;;  %v517_v14 = vsub.f32 %v490_v51, %v511_v5 }
 0x2a0   : > { %v512_v9 = vmul.f32 0.001953125, %v510_v7 }
 0x2a2   : > { %v514_v10 = vsub.f32 %v512_v9, %v513_v8 }
 0x2a4   : > { %v515_v11 = vmax.f32 %v514_v10, 0.0 }
 0x2a6   : > { %v518_v12 = vadd.f32 1e-05, %v515_v11 }
 0x2a8   : > { %845 = vrsqrt.f32 %v518_v12 }
 0x2b5   : > { %v846_v15 = vpop.eup %845 }
 0x2b6   : > { %v520_v18 = vmul.f32 %v846_v15, %v516_v13  ;;  %v521_v19 = vmul.f32 %v846_v15, %v517_v14 }
 0x2b8   : > { %v524_v22 = vmul.f32 %v522_v16, %v520_v18  ;;  %v525_v23 = vmul.f32 %v523_v17, %v521_v19 }
 0x2ba   : > { %v528_v24 = vadd.f32 %v526_v20, %v524_v22  ;;  %v529_v25 = vadd.f32 %v527_v21, %v525_v23 }
 0x2bc   : > { %530 = vst [vmem:[%s342_s29] sm:$0xff] %v528_v24  ;;  %531 = vst [vmem:[%s342_s29 + $0x8] sm:$0xff] %v529_v25 }
 0x2bd   : > { %1018 = shalt.err (!%p1015_p3)
}
 0x2be   : > { %s1019_s9 = scalar_lea.hbm %s1338_s16, 256  ;;  %s1023_s7 = scalar_lea.hbm %s1389_s6, 512 }
 0x2bf   : > { %p1020_p4 = scmp.ne.s32.totalorder %s1338_s16, %s1019_s9  ;;  %p1024_p2 = scmp.lt.s32.totalorder %s1338_s16, %s1389_s6 }
 0x2c0   : > { %p1025_p7 = scmp.lt.s32.totalorder %s1023_s7, %s1019_s9 }
 0x2c1   : > { %p1021_p12 = pnand %p1020_p4, %p1413_p11 }
 0x2c2   : > { %p1026_p8 = por %p1025_p7, %p1024_p2 }
 0x2c3   : > { %p1022_p6 = pneg %p1021_p12 }
 0x2c5   : > { %p1027_p10 = pnand %p1026_p8, %p1022_p6 }
 0x2c7   : > { %1030 = shalt.err (!%p1027_p10)
}
 0x2c8   : > { %s1096_s19 = smov 128   ;;  %s1097_s20 = smov 8  }
 0x2c9   : > { %752 = dma.vmem_to_hbm [thread:$0]  (%p1413_p11), %s1340_s17, 256, %s1338_s16, %s533_s27, %s1096_s19, %s1096_s19, %s1097_s20  }
 0x2ca PF: > { %s561_s18 = sand.u32 1, %s1069_s21   ;;  %p1414_p0 = scmp.ne.s32.totalorder %s1401_s11, 0 }
 0x2cb   : > { %p1415_p13 = scmp.ge.s32.totalorder %s1081_s24, 2  ;;  %s562_s8 = scalar_lea.sflag [#allocation4], %s561_s18 }
 0x2cd   : > { %p775_p5 = pnand %p1415_p13, %p1414_p0 }
 0x2cf   : > { %p776_p9 = pneg %p775_p5 }
 0x2d1   : > { %1064 = dma.done.wait (%p776_p9), %s562_s8, 256  }
 0x2d2   : > { %1066 = vsyncadd (%p776_p9), %s562_s8, 4294967040  ;;  %p22_p1 = scmp.ge.s32.totalorder %s1241_s10, 4   ;;  %s1416_s21 = smov %s1073_s22 }
 0x2d3   : > { %s1417_s22 = smov %s1077_s23  ;;  %s1418_s23 = smov %s1253_s26 }
 0x2d4   : > { %s1419_s24 = smov %s1241_s10  ;;  %24 = sbr.rel (!%p22_p1) target bundleno = 8 (0x8), region = 109 }
 0x2d9   :  { %567 = vsyncpa [#allocation3], 1 }
 0x2da   :  { %569 = vsyncpa [#allocation3 + $0x1], 1 }
 0x2db   :  { %570 = vsyncpa [#allocation6], 1 }
 0x2dc   :  { %571 = vsyncpa [#allocation9], 1 }
 0x2dd   :  { %572 = vsyncpa [#allocation12], 1 }
 0x2de   :  { %573 = vsyncpa [#allocation4], 1 }
 0x2df   :  { %575 = vsyncpa [#allocation4 + $0x1], 1 }

// kernel: tpu_custom_call.1
= control target key start
LH: loop header
LB: loop body
LE: loop exit
PB: predicated region body
PF: predicated region fallthrough
CT: control target
= control target key end

     0   :  { %11 = vsyncpa [#allocation3], 0  ;;  %s1383_s0 = inlined_call_operand.hbm [shape: f32[2,16,128], index: 0, kind: input, shape index: {}]   ;;  %s1384_s1 = inlined_call_operand.hbm [shape: f32[16,128], index: 1, kind: input, shape index: {}]   ;;  %s1385_s2 = inlined_call_operand.hbm [shape: bf16[128,128], index: 2, kind: input, shape index: {}]   ;;  %s1386_s3 = inlined_call_operand.hbm [shape: f32[16,128], index: 3, kind: input, shape index: {}]   ;;  %s1387_s4 = inlined_call_operand.hbm [shape: f32[16,128], index: 4, kind: input, shape index: {}]   ;;  %s1388_s5 = inlined_call_operand.hbm [shape: f32[16,128], index: 5, kind: input, shape index: {}]   ;;  %s1389_s6 = inlined_call_operand.hbm [shape: f32[2,16,128], index: 6, kind: output, shape index: {}]  }
   0x1   :  { %13 = vsyncpa [#allocation3 + $0x1], 0 }
   0x2   :  { %14 = vsyncpa [#allocation6], 0 }
   0x3   :  { %15 = vsyncpa [#allocation9], 0 }
   0x4   :  { %16 = vsyncpa [#allocation12], 0 }
   0x5   :  { %17 = vsyncpa [#allocation4], 0 }
   0x6   :  { %19 = vsyncpa [#allocation4 + $0x1], 0  ;;  %s1133_s21 = smov 0   ;;  %s1135_s22 = smov 0  }
   0x7   :  { %s1137_s23 = smov 0   ;;  %s1139_s24 = smov 0  }
   0x8 LB: > { %s1083_s25 = smov [#allocation5]   ;;  %s1154_s27 = sadd.s32 4294967295, %s1081_s24   ;;  %s1081_s24 = sphi %s1139_s24, %s1419_s24   ;;  %s1077_s23 = sphi %s1137_s23, %s1418_s23   ;;  %s1073_s22 = sphi %s1135_s22, %s1417_s22   ;;  %s1069_s21 = sphi %s1133_s21, %s1416_s21  }
   0x9   : > { %s199_s26 = sshll.u32 %s1083_s25, 4  ;;  %p668_p0 = scmp.ge.s32.totalorder %s1081_s24, 1  ;;  %s200_s26 = int_to_ptr.vmem [resolvable:$true] %s199_s26 }
   0xa   : > { %p1390_p1 = scmp.eq.s32.totalorder %s1154_s27, 0  ;;  %p187_p2 = scmp.lt.s32.totalorder %s1081_s24, 3 }
   0xb   : > { %s1084_s29 = smov [#allocation8]   ;;  %s1085_s8 = smov [#allocation7]  }
   0xc   : > { %p1159_p3 = pnand %p668_p0, %p187_p2  ;;  %s225_s30 = sshll.u32 %s1084_s29, 4  ;;  %s1172_s30 = int_to_ptr.vmem [resolvable:$true] %s225_s30 }
   0xd   : > { %s212_s9 = sshll.u32 %s1085_s8, 4  ;;  %s858_s11 = scalar_lea.vmem %s200_s26, 256  ;;  %s1174_s9 = int_to_ptr.vmem [resolvable:$true] %s212_s9 }
   0xe   : > { %s1396_s28 = scalar_select %p1159_p3, 1, 0 }
   0xf   : > { %p754_p5 = pneg %p1159_p3  ;;  %p859_p8 = scmp.ne.s32.totalorder %s200_s26, %s858_s11 }
  0x10   : > { %p866_p11 = scmp.lt.s32.totalorder %s200_s26, %s200_s26  ;;  %p867_p12 = scmp.lt.s32.totalorder %s858_s11, %s858_s11 }
  0x11   : > { %p1168_p6 = pnand %p754_p5, %p1390_p1 }
  0x12   : > { %p868_p13 = por %p867_p12, %p866_p11 }
  0x13   : > { %p1178_p7 = pneg %p1168_p6 }
  0x15   : > { %p861_p9 = pnand %p859_p8, %p1178_p7 }
  0x17   : > { %p862_p10 = pneg %p861_p9 }
  0x19   : > { %p869_p0 = pnand %p868_p13, %p862_p10 }
  0x1b   : > { %872 = shalt.err (!%p869_p0)
}
  0x1c   : > { %s1391_s12 = smov 128   ;;  %s1392_s13 = smov 8  }
  0x1d   : > { %757 = dma.hbm_to_vmem [thread:$0]  (!%p1168_p6), %s1384_s1, 256, %s200_s26, [#allocation6], %s1391_s12, %s1391_s12, %s1392_s13  }
  0x1e   : > { %s884_s16 = scalar_lea.vmem %s1172_s30, 256  ;;  %p892_p9 = scmp.lt.s32.totalorder %s1172_s30, %s1172_s30 }
  0x1f   : > { %p885_p2 = scmp.ne.s32.totalorder %s1172_s30, %s884_s16  ;;  %p893_p10 = scmp.lt.s32.totalorder %s884_s16, %s884_s16 }
  0x21   : > { %p887_p5 = pnand %p885_p2, %p1178_p7  ;;  %p894_p11 = por %p893_p10, %p892_p9 }
  0x23   : > { %p888_p8 = pneg %p887_p5 }
  0x25   : > { %p895_p12 = pnand %p894_p11, %p888_p8 }
  0x27   : > { %898 = shalt.err (!%p895_p12)
}
  0x28   : > { %763 = dma.hbm_to_vmem [thread:$0]  (!%p1168_p6), %s1386_s3, 256, %s1172_s30, [#allocation9], %s1391_s12, %s1391_s12, %s1392_s13  }
  0x29   : > { %s910_s19 = scalar_lea.vmem %s1174_s9, 1024  ;;  %p918_p5 = scmp.lt.s32.totalorder %s1174_s9, %s1174_s9 }
  0x2a   : > { %p911_p13 = scmp.ne.s32.totalorder %s1174_s9, %s910_s19  ;;  %p919_p8 = scmp.lt.s32.totalorder %s910_s19, %s910_s19 }
  0x2c   : > { %p913_p0 = pnand %p911_p13, %p1178_p7  ;;  %p920_p9 = por %p919_p8, %p918_p5 }
  0x2e   : > { %p914_p2 = pneg %p913_p0 }
  0x30   : > { %p921_p10 = pnand %p920_p9, %p914_p2 }
  0x32   : > { %924 = shalt.err (!%p921_p10)
}
  0x33   : > { %s1088_s20 = smov 64   ;;  %s1089_s25 = smov 4  }
  0x34   : > { %760 = dma.hbm_to_vmem [thread:$0]  (!%p1168_p6), %s1385_s2, 1024, %s1174_s9, [#allocation6], %s1088_s20, %s1088_s20, %s1089_s25  }
  0x35   : > { %s1090_s30 = smov [#allocation10]   ;;  %s1091_s11 = smov [#allocation11]  }
  0x36   : > { %s238_s8 = sshll.u32 %s1090_s30, 4  ;;  %s251_s14 = sshll.u32 %s1091_s11, 4  ;;  %s239_s8 = int_to_ptr.vmem [resolvable:$true] %s238_s8  ;;  %s252_s14 = int_to_ptr.vmem [resolvable:$true] %s251_s14 }
  0x37   : > { %s936_s15 = scalar_lea.vmem %s239_s8, 256  ;;  %p944_p0 = scmp.lt.s32.totalorder %s239_s8, %s239_s8 }
  0x38   : > { %p937_p11 = scmp.ne.s32.totalorder %s239_s8, %s936_s15  ;;  %p945_p2 = scmp.lt.s32.totalorder %s936_s15, %s936_s15 }
  0x3a   : > { %p939_p12 = pnand %p937_p11, %p1178_p7  ;;  %p946_p5 = por %p945_p2, %p944_p0 }
  0x3c   : > { %p940_p13 = pneg %p939_p12 }
  0x3e   : > { %p947_p8 = pnand %p946_p5, %p940_p13 }
  0x40   : > { %950 = shalt.err (!%p947_p8)
}
  0x41   : > { %766 = dma.hbm_to_vmem [thread:$0]  (!%p1168_p6), %s1387_s4, 256, %s239_s8, [#allocation9], %s1391_s12, %s1391_s12, %s1392_s13  }
  0x42   : > { %s962_s17 = scalar_lea.vmem %s252_s14, 256  ;;  %p970_p12 = scmp.lt.s32.totalorder %s252_s14, %s252_s14 }
  0x43   : > { %p963_p9 = scmp.ne.s32.totalorder %s252_s14, %s962_s17  ;;  %p971_p0 = scmp.lt.s32.totalorder %s962_s17, %s962_s17 }
  0x45   : > { %p965_p10 = pnand %p963_p9, %p1178_p7  ;;  %p972_p13 = por %p971_p0, %p970_p12 }
  0x47   : > { %p966_p11 = pneg %p965_p10 }
  0x49   : > { %p973_p2 = pnand %p972_p13, %p966_p11 }
  0x4b   : > { %976 = shalt.err (!%p973_p2)
}
  0x4c   : > { %769 = dma.hbm_to_vmem [thread:$0]  (!%p1168_p6), %s1388_s5, 256, %s252_s14, [#allocation12], %s1391_s12, %s1391_s12, %s1392_s13  }
  0x4d   : > { %s667_s7 = sadd.s32 4294967294, %s1081_s24   ;;  %s1241_s10 = sadd.s32 1, %s1081_s24  }
  0x4e   : > { %s32_s20 = sadd.s32 1, %s1077_s23  ;;  %s29_s25 = ssub.s32 %s1081_s24, %s1241_s10 }
  0x4f   : > { %p39_p7 = scmp.ne.s32.totalorder %s1077_s23, %s1073_s22  ;;  %p30_p5 = scmp.eq.s32.totalorder %s29_s25, 0 }
  0x50   : > { %p40_p8 = scmp.eq.s32.totalorder %s1081_s24, 0  ;;  %p45_p9 = scmp.ne.s32.totalorder %s1073_s22, %s1069_s21 }
  0x51   : > { %p174_p10 = scmp.eq.s32.totalorder %s1154_s27, 1  ;;  %p180_p0 = scmp.eq.s32.totalorder %s667_s7, 1 }
  0x52   : > { %s1253_s26 = scalar_select %p30_p5, %s1077_s23, %s32_s20  }
  0x53   : > { %p41_p11 = por %p40_p8, %p39_p7  ;;  %p1257_p12 = por %p1390_p1, %p45_p9 }
  0x54   : > { %p1261_p6 = por %p174_p10, %p39_p7  ;;  %p783_p13 = scmp.lt.s32.totalorder %s1081_s24, 2 }
  0x55   : > { %s1399_s29 = scalar_select %p1257_p12, 1, 0 }
  0x56   : > { %s1400_s30 = scalar_select %p1261_p6, 1, 0 }
  0x57   : > { %s265_s8 = sand.u32 1, %s1077_s23   ;;  %p1267_p2 = por %p180_p0, %p45_p9 }
  0x58   : > { %s675_s14 = sshll.u32 %s265_s8, 4  ;;  %s699_s15 = sshll.u32 %s1081_s24, 8 }
  0x59   : > { %s1401_s11 = scalar_select %p1267_p2, 1, 0 }
  0x5a   : > { %s1275_s17 = scalar_lea.hbm %s1383_s0, %s699_s15  ;;  %s269_s18 = scalar_lea.vmem [#allocation2], %s675_s14 }
  0x5b   : > { %s276_s19 = sshll.u32 %s269_s18, 4  ;;  %p1277_p7 = pnand %p783_p13, %p41_p11  ;;  %s1281_s19 = int_to_ptr.vmem [resolvable:$true] %s276_s19 }
  0x5c   : > { %s1283_s20 = scalar_lea.sflag [#allocation3], %s265_s8  ;;  %s977_s25 = scalar_lea.hbm %s1275_s17, 256 }
  0x5d   : > { %p978_p5 = scmp.ne.s32.totalorder %s1275_s17, %s977_s25  ;;  %p979_p8 = pneg %p1277_p7 }
  0x5e   : > { %s982_s14 = scalar_lea.hbm %s1383_s0, 512  ;;  %p983_p11 = scmp.lt.s32.totalorder %s1275_s17, %s1383_s0 }
  0x5f   : > { %p980_p9 = pnand %p979_p8, %p978_p5  ;;  %p984_p0 = scmp.lt.s32.totalorder %s982_s14, %s977_s25 }
  0x61   : > { %p981_p10 = pneg %p980_p9  ;;  %p985_p13 = por %p984_p0, %p983_p11 }
  0x63   : > { %p986_p4 = pnand %p985_p13, %p981_p10 }
  0x65   : > { %989 = shalt.err (!%p986_p4)
}
  0x66   : > { %s990_s8 = scalar_lea.vmem %s1281_s19, 256  ;;  %s1092_s12 = smov [#allocation2]  }
  0x67   : > { %p991_p1 = scmp.ne.s32.totalorder %s1281_s19, %s990_s8  ;;  %s995_s13 = sshll.u32 %s1092_s12, 4  ;;  %s996_s13 = int_to_ptr.vmem [resolvable:$false] %s995_s13 }
  0x68   : > { %s997_s15 = scalar_lea.vmem %s996_s13, 512  ;;  %p998_p9 = scmp.lt.s32.totalorder %s1281_s19, %s996_s13 }
  0x69   : > { %p993_p2 = pnand %p991_p1, %p979_p8  ;;  %p999_p6 = scmp.lt.s32.totalorder %s997_s15, %s990_s8 }
  0x6b   : > { %p994_p5 = pneg %p993_p2  ;;  %p1000_p12 = por %p999_p6, %p998_p9 }
  0x6d   : > { %p1001_p3 = pnand %p1000_p12, %p994_p5 }
  0x6f   : > { %1004 = shalt.err (!%p1001_p3)
}
  0x70   : > { %s1403_s25 = smov 8   ;;  %s1404_s9 = smov 128  }
  0x71   : > { %773 = dma.hbm_to_vmem [thread:$0]  (!%p1277_p7), %s1275_s17, 256, %s1281_s19, %s1283_s20, %s1404_s9, %s1404_s9, %s1403_s25  }
  0x72   : > { %p1405_p1 = scmp.ne.s32.totalorder %s1396_s28, 0 }
  0x73   : > { %s1310_s12 = sand.u32 (!%p1405_p1), 1, %s1073_s22   ;;  %p1406_p3 = scmp.ne.s32.totalorder (!%p1405_p1), %s1399_s29, 0 }
  0x74   : > { %288 = sbr.rel (%p1405_p1) target bundleno = 714 (0x2ca), region = 44  ;;  %s679_s13 = sshll.u32 (!%p1405_p1), %s1310_s12, 4 }
  0x75   : > { %s291_s14 = scalar_lea.sflag (!%p1405_p1), [#allocation3], %s1310_s12  ;;  %s294_s7 = scalar_lea.vmem (!%p1405_p1), [#allocation2], %s679_s13 }
  0x79   : > { %1048 = dma.done.wait (%p1406_p3), %s291_s14, 256  }
  0x7a   : > { %1050 = vsyncadd (%p1406_p3), %s291_s14, 4294967040  ;;  %p1407_p4 = scmp.eq.s32.totalorder %s1154_s27, 0 }
  0x7c   : > { %1052 = dma.done.wait (%p1407_p4), [#allocation6], 1280   ;;  %p1408_p12 = pmov %p1407_p4 }
  0x7d   : > { %p1409_p6 = pmov %p1407_p4 }
  0x7e   : > { %1054 = vsyncadd (%p1408_p12), [#allocation6], 4294966016 }
  0x7f   : > { %1056 = dma.done.wait (%p1409_p6), [#allocation9], 512   ;;  %p1410_p2 = pmov %p1407_p4 }
  0x81   : > { %1058 = vsyncadd (%p1410_p2), [#allocation9], 4294966784  ;;  %p1411_p7 = pmov %p1410_p2 }
  0x82   : > { %p1412_p8 = pmov %p1410_p2 }
  0x83   : > { %1060 = dma.done.wait (%p1411_p7), [#allocation12], 256  }
  0x84   : > { %1062 = vsyncadd (%p1412_p8), [#allocation12], 4294967040  ;;  %v344_v0 = vld [vmem:[%s294_s7] sm:$0xff]  ;;  %v345_v1 = vld [vmem:[%s294_s7 + $0x8] sm:$0xff]  ;;  %v1093_v7 = vmov 0.0   ;;  %vm1094_vm0 = vmmov 0  }
  0x85   : > { %v346_v2 = vadd.f32 %v345_v1, %v344_v0  ;;  %v355_v3 = vmul.f32 %v344_v0, %v344_v0  ;;  %v356_v4 = vmul.f32 %v345_v1, %v345_v1  ;;  %v835_v6 = vld [vmem:[#allocation7 + $0x38] sm:$0xff]   ;;  %710 = vmatprep.subr.bf16.mxu0 %v1093_v7  ;;  %v836_v8 = vld [vmem:[#allocation7 + $0x30] sm:$0xff]   ;;  %v837_v9 = vld [vmem:[#allocation7 + $0x28] sm:$0xff]   ;;  %726 = vmatprep.mubr.msk.bf16.mxu0 %vm1094_vm0, %v1093_v7  ;;  %s700_s28 = sshll.u32 %s1154_s27, 8  ;;  %s342_s29 = scalar_lea.vmem [#allocation13], %s679_s13 }
  0x86   : > { %711 = vmatpush3.bf16.msra.mxu0 %v835_v6  ;;  %v838_v10 = vld [vmem:[#allocation7 + $0x20] sm:$0xff]   ;;  %v839_v11 = vld [vmem:[#allocation7 + $0x18] sm:$0xff]   ;;  %v840_v12 = vld [vmem:[#allocation7 + $0x10] sm:$0xff]   ;;  %s546_s17 = sshll.u32 %s342_s29, 4  ;;  %s1338_s16 = scalar_lea.hbm %s1389_s6, %s700_s28  ;;  %s1340_s17 = int_to_ptr.vmem [resolvable:$true] %s546_s17 }
  0x87   : > { %347 = vadd.xlane.f32.xlu0 %v346_v2  ;;  %v357_v5 = vadd.f32 %v356_v4, %v355_v3  ;;  %712 = vmatprep.subr.bf16.mxu0 %v1093_v7  ;;  %v841_v13 = vld [vmem:[#allocation7 + $0x8] sm:$0xff]   ;;  %v842_v14 = vld [vmem:[#allocation7] sm:$0xff]   ;;  %v377_v38 = vld [vmem:[#allocation5] sm:$0xff]  ;;  %s533_s27 = scalar_lea.sflag [#allocation4], %s1310_s12  ;;  %s1005_s18 = scalar_lea.vmem %s1340_s17, 256 }
  0x88   : > { %v378_v39 = vld [vmem:[#allocation5 + $0x8] sm:$0xff]  ;;  %v487_v46 = vld [vmem:[#allocation8] sm:$0xff]  ;;  %v488_v48 = vld [vmem:[#allocation8 + $0x8] sm:$0xff]  ;;  %p1006_p10 = scmp.ne.s32.totalorder %s1340_s17, %s1005_s18  ;;  %p1413_p11 = scmp.ne.s32.totalorder %s1400_s30, 0 }
  0x89   : > { %s1095_s8 = smov [#allocation13]  }
  0x8a   : > { %713 = vmatpush3.bf16.msra.mxu0 %v836_v8  ;;  %p1007_p0 = pnand %p1006_p10, %p1413_p11  ;;  %s1009_s15 = sshll.u32 %s1095_s8, 4  ;;  %s1010_s15 = int_to_ptr.vmem [resolvable:$false] %s1009_s15 }
  0x8b   : > { %358 = vadd.xlane.f32.xlu0 %v357_v5  ;;  %714 = vmatprep.subr.bf16.mxu0 %v1093_v7  ;;  %s1011_s25 = scalar_lea.vmem %s1010_s15, 512  ;;  %p1012_p5 = scmp.lt.s32.totalorder %s1340_s17, %s1010_s15 }
  0x8c   : > { %p1008_p13 = pneg %p1007_p0  ;;  %p1013_p9 = scmp.lt.s32.totalorder %s1011_s25, %s1005_s18 }
  0x8e   : > { %715 = vmatpush3.bf16.msra.mxu0 %v837_v9  ;;  %p1014_p1 = por %p1013_p9, %p1012_p5 }
  0x8f   : > { %716 = vmatprep.subr.bf16.mxu0 %v1093_v7 }
  0x90   : > { %p1015_p3 = pnand %p1014_p1, %p1008_p13 }
  0x92   : > { %717 = vmatpush3.bf16.msra.mxu0 %v838_v10 }
  0x93   : > { %718 = vmatprep.subr.bf16.mxu0 %v1093_v7 }
  0x96   : > { %719 = vmatpush3.bf16.msra.mxu0 %v839_v11 }
  0x97   : > { %720 = vmatprep.subr.bf16.mxu0 %v1093_v7 }
  0x9a   : > { %721 = vmatpush3.bf16.msra.mxu0 %v840_v12 }
  0x9b   : > { %722 = vmatprep.subr.bf16.mxu0 %v1093_v7 }
  0x9e   : > { %723 = vmatpush3.bf16.msra.mxu0 %v841_v13 }
  0x9f   : > { %724 = vmatprep.subr.bf16.mxu0 %v1093_v7 }
  0xa2   : > { %725 = vmatpush3.bf16.msra.mxu0 %v842_v14 }
 0x110   : > { %v348_v15 = vpop.xlane.xlu0 %347 }
 0x111   : > { %v349_v16 = vrot.slane %v348_v15, 4 }
 0x113   : > { %v350_v17 = vadd.f32 %v349_v16, %v348_v15  ;;  %v522_v16 = vld [vmem:[#allocation10] sm:$0xff] }
 0x114   : > { %v359_v18 = vpop.xlane.xlu0 %358 }
 0x115   : > { %v351_v19 = vrot.slane %v350_v17, 2  ;;  %v360_v20 = vrot.slane %v359_v18, 4 }
 0x117   : > { %v352_v21 = vadd.f32 %v351_v19, %v350_v17  ;;  %v361_v22 = vadd.f32 %v360_v20, %v359_v18  ;;  %v523_v17 = vld [vmem:[#allocation10 + $0x8] sm:$0xff]  ;;  %v526_v20 = vld [vmem:[#allocation11] sm:$0xff] }
 0x119   : > { %v353_v23 = vrot.slane %v352_v21, 1  ;;  %v362_v24 = vrot.slane %v361_v22, 2 }
 0x11b   : > { %v354_v25 = vadd.f32 %v353_v23, %v352_v21  ;;  %v363_v26 = vadd.f32 %v362_v24, %v361_v22  ;;  %v527_v21 = vld [vmem:[#allocation11 + $0x8] sm:$0xff] }
 0x11d   : > { %v366_v27 = vmul.f32 0.0009765625, %v354_v25  ;;  %v364_v28 = vrot.slane %v363_v26, 1 }
 0x11f   : > { %v365_v29 = vadd.f32 %v364_v28, %v363_v26  ;;  %v368_v30 = vmul.f32 %v366_v27, %v366_v27  ;;  %v371_v35 = vsub.f32 %v344_v0, %v366_v27  ;;  %v372_v36 = vsub.f32 %v345_v1, %v366_v27 }
 0x121   : > { %v367_v31 = vmul.f32 0.0009765625, %v365_v29 }
 0x123   : > { %v369_v32 = vsub.f32 %v367_v31, %v368_v30 }
 0x125   : > { %v370_v33 = vmax.f32 %v369_v32, 0.0 }
 0x127   : > { %v373_v34 = vadd.f32 1e-05, %v370_v33 }
 0x129   : > { %843 = vrsqrt.f32 %v373_v34 }
 0x136   : > { %v844_v37 = vpop.eup %843 }
 0x137   : > { %v375_v40 = vmul.f32 %v844_v37, %v371_v35  ;;  %v376_v41 = vmul.f32 %v844_v37, %v372_v36 }
 0x139   : > { %v379_v42 = vmul.f32 %v377_v38, %v375_v40  ;;  %v380_v43 = vmul.f32 %v378_v39, %v376_v41 }
 0x13b   : > { %v381_v44 = vpack.c.bf16 %v380_v43, %v379_v42 }
 0x13d   : > { %727 = vmatmul.mubr.bf16.vlgmr.msra.gmra.mxu0 %v381_v44 }
 0x1fd   : > { %v480_v45 = vpop.f32.mrf.mxu0 }
 0x1fe   : > { %v489_v50 = vadd.f32 %v487_v46, %v480_v45 }
 0x1ff   : > { %v728_v47 = vpop.f32.mrf.mxu0 }
 0x200   : > { %v500_v55 = vmul.f32 %v489_v50, %v489_v50 }
 0x201   : > { %v483_v49 = vpop.f32.mrf.mxu0 }
 0x202   : > { %v490_v51 = vadd.f32 %v488_v48, %v483_v49 }
 0x203   : > { %v729_v52 = vpop.f32.mrf.mxu0 }
 0x204   : > { %v491_v53 = vadd.f32 %v490_v51, %v489_v50  ;;  %v501_v54 = vmul.f32 %v490_v51, %v490_v51 }
 0x206   : > { %492 = vadd.xlane.f32.xlu1 %v491_v53  ;;  %v502_v56 = vadd.f32 %v501_v54, %v500_v55 }
 0x20a   : > { %503 = vadd.xlane.f32.xlu1 %v502_v56 }
 0x28f   : > { %v493_v57 = vpop.xlane.xlu1 %492 }
 0x290   : > { %v494_v58 = vrot.slane %v493_v57, 4 }
 0x292   : > { %v495_v59 = vadd.f32 %v494_v58, %v493_v57 }
 0x293   : > { %v504_v60 = vpop.xlane.xlu1 %503 }
 0x294   : > { %v496_v61 = vrot.slane %v495_v59, 2  ;;  %v505_v62 = vrot.slane %v504_v60, 4 }
 0x296   : > { %v497_v63 = vadd.f32 %v496_v61, %v495_v59  ;;  %v506_v0 = vadd.f32 %v505_v62, %v504_v60 }
 0x298   : > { %v498_v1 = vrot.slane %v497_v63, 1  ;;  %v507_v2 = vrot.slane %v506_v0, 2 }
 0x29a   : > { %v499_v3 = vadd.f32 %v498_v1, %v497_v63  ;;  %v508_v4 = vadd.f32 %v507_v2, %v506_v0 }
 0x29c   : > { %v511_v5 = vmul.f32 0.001953125, %v499_v3  ;;  %v509_v6 = vrot.slane %v508_v4, 1 }
 0x29e   : > { %v510_v7 = vadd.f32 %v509_v6, %v508_v4  ;;  %v513_v8 = vmul.f32 %v511_v5, %v511_v5  ;;  %v516_v13 = vsub.f32 %v489_v50, %v511_v5  ;;  %v517_v14 = vsub.f32 %v490_v51, %v511_v5 }
 0x2a0   : > { %v512_v9 = vmul.f32 0.001953125, %v510_v7 }
 0x2a2   : > { %v514_v10 = vsub.f32 %v512_v9, %v513_v8 }
 0x2a4   : > { %v515_v11 = vmax.f32 %v514_v10, 0.0 }
 0x2a6   : > { %v518_v12 = vadd.f32 1e-05, %v515_v11 }
 0x2a8   : > { %845 = vrsqrt.f32 %v518_v12 }
 0x2b5   : > { %v846_v15 = vpop.eup %845 }
 0x2b6   : > { %v520_v18 = vmul.f32 %v846_v15, %v516_v13  ;;  %v521_v19 = vmul.f32 %v846_v15, %v517_v14 }
 0x2b8   : > { %v524_v22 = vmul.f32 %v522_v16, %v520_v18  ;;  %v525_v23 = vmul.f32 %v523_v17, %v521_v19 }
 0x2ba   : > { %v528_v24 = vadd.f32 %v526_v20, %v524_v22  ;;  %v529_v25 = vadd.f32 %v527_v21, %v525_v23 }
 0x2bc   : > { %530 = vst [vmem:[%s342_s29] sm:$0xff] %v528_v24  ;;  %531 = vst [vmem:[%s342_s29 + $0x8] sm:$0xff] %v529_v25 }
 0x2bd   : > { %1018 = shalt.err (!%p1015_p3)
}
 0x2be   : > { %s1019_s9 = scalar_lea.hbm %s1338_s16, 256  ;;  %s1023_s7 = scalar_lea.hbm %s1389_s6, 512 }
 0x2bf   : > { %p1020_p4 = scmp.ne.s32.totalorder %s1338_s16, %s1019_s9  ;;  %p1024_p2 = scmp.lt.s32.totalorder %s1338_s16, %s1389_s6 }
 0x2c0   : > { %p1025_p7 = scmp.lt.s32.totalorder %s1023_s7, %s1019_s9 }
 0x2c1   : > { %p1021_p12 = pnand %p1020_p4, %p1413_p11 }
 0x2c2   : > { %p1026_p8 = por %p1025_p7, %p1024_p2 }
 0x2c3   : > { %p1022_p6 = pneg %p1021_p12 }
 0x2c5   : > { %p1027_p10 = pnand %p1026_p8, %p1022_p6 }
 0x2c7   : > { %1030 = shalt.err (!%p1027_p10)
}
 0x2c8   : > { %s1096_s19 = smov 128   ;;  %s1097_s20 = smov 8  }
 0x2c9   : > { %752 = dma.vmem_to_hbm [thread:$0]  (%p1413_p11), %s1340_s17, 256, %s1338_s16, %s533_s27, %s1096_s19, %s1096_s19, %s1097_s20  }
 0x2ca PF: > { %s561_s18 = sand.u32 1, %s1069_s21   ;;  %p1414_p0 = scmp.ne.s32.totalorder %s1401_s11, 0 }
 0x2cb   : > { %p1415_p13 = scmp.ge.s32.totalorder %s1081_s24, 2  ;;  %s562_s8 = scalar_lea.sflag [#allocation4], %s561_s18 }
 0x2cd   : > { %p775_p5 = pnand %p1415_p13, %p1414_p0 }
 0x2cf   : > { %p776_p9 = pneg %p775_p5 }
 0x2d1   : > { %1064 = dma.done.wait (%p776_p9), %s562_s8, 256  }
 0x2d2   : > { %1066 = vsyncadd (%p776_p9), %s562_s8, 4294967040  ;;  %p22_p1 = scmp.ge.s32.totalorder %s1241_s10, 4   ;;  %s1416_s21 = smov %s1073_s22 }
 0x2d3   : > { %s1417_s22 = smov %s1077_s23  ;;  %s1418_s23 = smov %s1253_s26 }
 0x2d4   : > { %s1419_s24 = smov %s1241_s10  ;;  %24 = sbr.rel (!%p22_p1) target bundleno = 8 (0x8), region = 109 }
 0x2d9   :  { %567 = vsyncpa [#allocation3], 1 }
 0x2da   :  { %569 = vsyncpa [#allocation3 + $0x1], 1 }
 0x2db   :  { %570 = vsyncpa [#allocation6], 1 }
 0x2dc   :  { %571 = vsyncpa [#allocation9], 1 }
 0x2dd   :  { %572 = vsyncpa [#allocation12], 1 }
 0x2de   :  { %573 = vsyncpa [#allocation4], 1 }
 0x2df   :  { %575 = vsyncpa [#allocation4 + $0x1], 1 }

</bundles_post_ra>
